<compile_context>
chip_gen: v7x
topology: tpu7x:2x2x1
jax: 0.10.0
libtpu: 0.0.40
codegen_flags: <defaults>
</compile_context>

<pallas_src>
import functools

import jax
import jax.numpy as jnp
from jax import lax
from jax.experimental import pallas as pl
from jax.experimental.pallas import tpu as pltpu

_LN_EPS = 1e-12


def _intermediate_i_s_kernel(
    x6_ref,      # (TM, 6H)  concatenated [cat, left, right] features
    hI_ref,      # (TM, H)   residual for the intent branch
    hS_ref,      # (TM, H)   residual for the slot branch
    w_in_ref,    # (I, 6H)   dense_in weight (PyTorch layout: out, in)
    b_in_ref,    # (1, I)
    w_out_ref,   # (H, I)    dense_out weight (PyTorch layout: out, in)
    b_out_ref,   # (1, H)
    gI_ref,      # (1, H)    LayerNorm_I weight
    bI_ref,      # (1, H)    LayerNorm_I bias
    gS_ref,      # (1, H)    LayerNorm_S weight
    bS_ref,      # (1, H)    LayerNorm_S bias
    oI_ref,      # (TM, H)   output: hidden_states_I_NEW
    oS_ref,      # (TM, H)   output: hidden_states_S_NEW
):
    # dense_in: contract the shared last dim directly -> (TM, I), f32 accumulate.
    h = lax.dot_general(
        x6_ref[...], w_in_ref[...],
        dimension_numbers=(((1,), (1,)), ((), ())),
        preferred_element_type=jnp.float32,
    )
    h = h + b_in_ref[...].astype(jnp.float32)
    h = jnp.maximum(h, 0.0)                      # ReLU

    # dense_out: (TM, I) x (H, I) -> (TM, H), f32 accumulate.
    y = lax.dot_general(
        h.astype(w_out_ref.dtype), w_out_ref[...],
        dimension_numbers=(((1,), (1,)), ((), ())),
        preferred_element_type=jnp.float32,
    )
    y = y + b_out_ref[...].astype(jnp.float32)
    # dropout: identity (inference mode)

    def _layernorm(a, g, b):
        # TF-style LayerNorm: eps inside the sqrt, biased variance.
        u = jnp.mean(a, axis=-1, keepdims=True)
        d = a - u
        s = jnp.mean(d * d, axis=-1, keepdims=True)
        inv = lax.rsqrt(s + _LN_EPS)
        return g.astype(jnp.float32) * (d * inv) + b.astype(jnp.float32)

    aI = y + hI_ref[...].astype(jnp.float32)
    aS = y + hS_ref[...].astype(jnp.float32)

    # single cast on the final tile writes
    oI_ref[...] = _layernorm(aI, gI_ref[...], bI_ref[...]).astype(oI_ref.dtype)
    oS_ref[...] = _layernorm(aS, gS_ref[...], bS_ref[...]).astype(oS_ref.dtype)


@functools.partial(jax.jit, static_argnames=("tile_m",))
def intermediate_i_s(
    hidden_states_I,   # (B, T, H)
    hidden_states_S,   # (B, T, H)
    w_in,              # (I, 6H)  dense_in.weight
    b_in,              # (I,)     dense_in.bias
    w_out,             # (H, I)   dense_out.weight
    b_out,             # (H,)     dense_out.bias
    gamma_I, beta_I,   # (H,), (H,)   LayerNorm_I
    gamma_S, beta_S,   # (H,), (H,)   LayerNorm_S
    *, tile_m=256,
):
    B, T, H = hidden_states_I.shape
    I = w_in.shape[0]
    assert hidden_states_S.shape == (B, T, H)
    assert w_in.shape == (I, 6 * H) and w_out.shape == (H, I)

    # ---- wrapper-side layout plumbing: build the 6H neighbor-window input ----
    x_cat = jnp.concatenate([hidden_states_I, hidden_states_S], axis=2)  # (B,T,2H)
    pad = jnp.zeros((B, 1, 2 * H), dtype=x_cat.dtype)
    h_left = jnp.concatenate([pad, x_cat[:, : T - 1, :]], axis=1)
    h_right = jnp.concatenate([x_cat[:, 1:, :], pad], axis=1)
    x6 = jnp.concatenate([x_cat, h_left, h_right], axis=2)               # (B,T,6H)

    # ---- flatten (B, T) into one row axis and tile it ----
    M = B * T
    x6f = x6.reshape(M, 6 * H)
    hIf = hidden_states_I.reshape(M, H)
    hSf = hidden_states_S.reshape(M, H)

    tm = min(tile_m, ((M + 7) // 8) * 8)          # 8-aligned sublane tile
    Mp = pl.cdiv(M, tm) * tm
    if Mp != M:
        r = Mp - M
        x6f = jnp.pad(x6f, ((0, r), (0, 0)))
        hIf = jnp.pad(hIf, ((0, r), (0, 0)))
        hSf = jnp.pad(hSf, ((0, r), (0, 0)))

    grid = (Mp // tm,)

    row6_spec = pl.BlockSpec((tm, 6 * H), lambda i: (i, 0))
    rowh_spec = pl.BlockSpec((tm, H), lambda i: (i, 0))

    def _resident(shape):
        # constant index_map -> block stays resident in VMEM across row tiles
        return pl.BlockSpec(shape, lambda i: (0, 0))

    out_I, out_S = pl.pallas_call(
        _intermediate_i_s_kernel,
        out_shape=(
            jax.ShapeDtypeStruct((Mp, H), hidden_states_I.dtype),
            jax.ShapeDtypeStruct((Mp, H), hidden_states_S.dtype),
        ),
        grid_spec=pl.GridSpec(
            grid=grid,
            in_specs=[
                row6_spec,                 # x6
                rowh_spec,                 # hidden_states_I residual
                rowh_spec,                 # hidden_states_S residual
                _resident((I, 6 * H)),     # W_in
                _resident((1, I)),         # b_in
                _resident((H, I)),         # W_out
                _resident((1, H)),         # b_out
                _resident((1, H)),         # gamma_I
                _resident((1, H)),         # beta_I
                _resident((1, H)),         # gamma_S
                _resident((1, H)),         # beta_S
            ],
            out_specs=(rowh_spec, rowh_spec),
        ),
        compiler_params=pltpu.CompilerParams(
            dimension_semantics=("parallel",),
        ),
    )(
        x6f, hIf, hSf,
        w_in, b_in.reshape(1, I),
        w_out, b_out.reshape(1, H),
        gamma_I.reshape(1, H), beta_I.reshape(1, H),
        gamma_S.reshape(1, H), beta_S.reshape(1, H),
    )

    out_I = out_I[:M].reshape(B, T, H)
    out_S = out_S[:M].reshape(B, T, H)
    return out_I, out_S


# ---------------------------- pure-JAX reference ----------------------------
def _reference(hI, hS, w_in, b_in, w_out, b_out, gI, bI, gS, bS):
    x_cat = jnp.concatenate([hI, hS], axis=2)
    B, T, H2 = x_cat.shape
    pad = jnp.zeros((B, 1, H2), dtype=x_cat.dtype)
    h_left = jnp.concatenate([pad, x_cat[:, : T - 1, :]], axis=1)
    h_right = jnp.concatenate([x_cat[:, 1:, :], pad], axis=1)
    x6 = jnp.concatenate([x_cat, h_left, h_right], axis=2)

    h = jnp.einsum("btk,ik->bti", x6, w_in,
                   preferred_element_type=jnp.float32) + b_in
    h = jnp.maximum(h, 0.0)
    y = jnp.einsum("bti,hi->bth", h, w_out,
                   preferred_element_type=jnp.float32) + b_out

    def ln(a, g, b):
        u = jnp.mean(a, axis=-1, keepdims=True)
        s = jnp.mean((a - u) ** 2, axis=-1, keepdims=True)
        return g * ((a - u) / jnp.sqrt(s + _LN_EPS)) + b

    return ln(y + hI, gI, bI), ln(y + hS, gS, bS)


if __name__ == "__main__":
    key = jax.random.PRNGKey(0)
    ks = jax.random.split(key, 10)

    B, T, H = 2, 8, 32          # batch, seq len, hidden
    I_SIZE = 64                 # intermediate_size

    hidden_states_I = jax.random.normal(ks[0], (B, T, H), dtype=jnp.float32)
    hidden_states_S = jax.random.normal(ks[1], (B, T, H), dtype=jnp.float32)

    # dense_in: Linear(6H -> I); dense_out: Linear(I -> H)  (PyTorch (out, in) layout)
    w_in = jax.random.normal(ks[2], (I_SIZE, 6 * H), dtype=jnp.float32) * 0.05
    b_in = jax.random.normal(ks[3], (I_SIZE,), dtype=jnp.float32) * 0.05
    w_out = jax.random.normal(ks[4], (H, I_SIZE), dtype=jnp.float32) * 0.05
    b_out = jax.random.normal(ks[5], (H,), dtype=jnp.float32) * 0.05

    gamma_I = 1.0 + 0.1 * jax.random.normal(ks[6], (H,), dtype=jnp.float32)
    beta_I = 0.1 * jax.random.normal(ks[7], (H,), dtype=jnp.float32)
    gamma_S = 1.0 + 0.1 * jax.random.normal(ks[8], (H,), dtype=jnp.float32)
    beta_S = 0.1 * jax.random.normal(ks[9], (H,), dtype=jnp.float32)

    out_I, out_S = intermediate_i_s(
        hidden_states_I, hidden_states_S,
        w_in, b_in, w_out, b_out,
        gamma_I, beta_I, gamma_S, beta_S,
    )
    jax.block_until_ready((out_I, out_S))

    ref_I, ref_S = _reference(
        hidden_states_I, hidden_states_S,
        w_in, b_in, w_out, b_out,
        gamma_I, beta_I, gamma_S, beta_S,
    )

    assert out_I.shape == (B, T, H) and out_S.shape == (B, T, H)
    assert jnp.allclose(out_I, ref_I, atol=1e-3, rtol=1e-3), (
        float(jnp.max(jnp.abs(out_I - ref_I))))
    assert jnp.allclose(out_S, ref_S, atol=1e-3, rtol=1e-3), (
        float(jnp.max(jnp.abs(out_S - ref_S))))

    print("KERNEL_OK")
</pallas_src>

<mosaic_0001>
module attributes {stable_mosaic.version = 11 : i64} {
  func.func @_intermediate_i_s_kernel(%arg0: i32, %arg1: memref<16x192xf32, #tpu.memory_space<vmem>>, %arg2: memref<16x32xf32, #tpu.memory_space<vmem>>, %arg3: memref<16x32xf32, #tpu.memory_space<vmem>>, %arg4: memref<64x192xf32, #tpu.memory_space<vmem>>, %arg5: memref<1x64xf32, #tpu.memory_space<vmem>>, %arg6: memref<32x64xf32, #tpu.memory_space<vmem>>, %arg7: memref<1x32xf32, #tpu.memory_space<vmem>>, %arg8: memref<1x32xf32, #tpu.memory_space<vmem>>, %arg9: memref<1x32xf32, #tpu.memory_space<vmem>>, %arg10: memref<1x32xf32, #tpu.memory_space<vmem>>, %arg11: memref<1x32xf32, #tpu.memory_space<vmem>>, %arg12: memref<16x32xf32, #tpu.memory_space<vmem>>, %arg13: memref<16x32xf32, #tpu.memory_space<vmem>>) attributes {dimension_semantics = [#tpu.dimension_semantics<parallel>], iteration_bounds = array<i64: 1>, scalar_prefetch = 0 : i64, scratch_operands = 0 : i64, tpu.core_type = #tpu.core_type<tc>, window_params = [{transform_indices = @transform_0, window_bounds = array<i64: 16, 192>}, {transform_indices = @transform_1, window_bounds = array<i64: 16, 32>}, {transform_indices = @transform_2, window_bounds = array<i64: 16, 32>}, {pipeline_mode = #tpu.pipeline_mode<synchronous>, transform_indices = @transform_3, window_bounds = array<i64: 64, 192>}, {pipeline_mode = #tpu.pipeline_mode<synchronous>, transform_indices = @transform_4, window_bounds = array<i64: 1, 64>}, {pipeline_mode = #tpu.pipeline_mode<synchronous>, transform_indices = @transform_5, window_bounds = array<i64: 32, 64>}, {pipeline_mode = #tpu.pipeline_mode<synchronous>, transform_indices = @transform_6, window_bounds = array<i64: 1, 32>}, {pipeline_mode = #tpu.pipeline_mode<synchronous>, transform_indices = @transform_7, window_bounds = array<i64: 1, 32>}, {pipeline_mode = #tpu.pipeline_mode<synchronous>, transform_indices = @transform_8, window_bounds = array<i64: 1, 32>}, {pipeline_mode = #tpu.pipeline_mode<synchronous>, transform_indices = @transform_9, window_bounds = array<i64: 1, 32>}, {pipeline_mode = #tpu.pipeline_mode<synchronous>, transform_indices = @transform_10, window_bounds = array<i64: 1, 32>}, {transform_indices = @transform_11, window_bounds = array<i64: 16, 32>}, {transform_indices = @transform_12, window_bounds = array<i64: 16, 32>}]} {
    %c0 = arith.constant 0 : index
    %c0_0 = arith.constant 0 : index
    %0 = vector.load %arg1[%c0, %c0_0] : memref<16x192xf32, #tpu.memory_space<vmem>>, vector<16x192xf32>
    %c0_1 = arith.constant 0 : index
    %c0_2 = arith.constant 0 : index
    %1 = vector.load %arg4[%c0_1, %c0_2] : memref<64x192xf32, #tpu.memory_space<vmem>>, vector<64x192xf32>
    %cst = arith.constant dense<0.000000e+00> : vector<16x64xf32>
    %2 = tpu.matmul %0, %1, %cst {dimension_numbers = #tpu.dot_dimension_numbers<[1], [1], [0], [0], [0, 0, 1, 0], [], []>} : vector<16x192xf32>, vector<64x192xf32>, vector<16x64xf32> -> vector<16x64xf32>
    %c0_3 = arith.constant 0 : index
    %c0_4 = arith.constant 0 : index
    %3 = vector.load %arg5[%c0_3, %c0_4] : memref<1x64xf32, #tpu.memory_space<vmem>>, vector<1x64xf32>
    %4 = vector.broadcast %3 : vector<1x64xf32> to vector<16x64xf32>
    %5 = arith.addf %2, %4 : vector<16x64xf32>
    %cst_5 = arith.constant 0.000000e+00 : f32
    %6 = vector.broadcast %cst_5 : f32 to vector<16x64xf32>
    %7 = arith.maximumf %5, %6 : vector<16x64xf32>
    %c0_6 = arith.constant 0 : index
    %c0_7 = arith.constant 0 : index
    %8 = vector.load %arg6[%c0_6, %c0_7] : memref<32x64xf32, #tpu.memory_space<vmem>>, vector<32x64xf32>
    %cst_8 = arith.constant dense<0.000000e+00> : vector<16x32xf32>
    %9 = tpu.matmul %7, %8, %cst_8 {dimension_numbers = #tpu.dot_dimension_numbers<[1], [1], [0], [0], [0, 0, 1, 0], [], []>} : vector<16x64xf32>, vector<32x64xf32>, vector<16x32xf32> -> vector<16x32xf32>
    %c0_9 = arith.constant 0 : index
    %c0_10 = arith.constant 0 : index
    %10 = vector.load %arg7[%c0_9, %c0_10] : memref<1x32xf32, #tpu.memory_space<vmem>>, vector<1x32xf32>
    %11 = vector.broadcast %10 : vector<1x32xf32> to vector<16x32xf32>
    %12 = arith.addf %9, %11 : vector<16x32xf32>
    %c0_11 = arith.constant 0 : index
    %c0_12 = arith.constant 0 : index
    %13 = vector.load %arg2[%c0_11, %c0_12] : memref<16x32xf32, #tpu.memory_space<vmem>>, vector<16x32xf32>
    %14 = arith.addf %12, %13 : vector<16x32xf32>
    %c0_13 = arith.constant 0 : index
    %c0_14 = arith.constant 0 : index
    %15 = vector.load %arg3[%c0_13, %c0_14] : memref<16x32xf32, #tpu.memory_space<vmem>>, vector<16x32xf32>
    %16 = arith.addf %12, %15 : vector<16x32xf32>
    %c0_15 = arith.constant 0 : index
    %c0_16 = arith.constant 0 : index
    %17 = vector.load %arg8[%c0_15, %c0_16] : memref<1x32xf32, #tpu.memory_space<vmem>>, vector<1x32xf32>
    %c0_17 = arith.constant 0 : index
    %c0_18 = arith.constant 0 : index
    %18 = vector.load %arg9[%c0_17, %c0_18] : memref<1x32xf32, #tpu.memory_space<vmem>>, vector<1x32xf32>
    %cst_19 = arith.constant dense<0.000000e+00> : vector<16xf32>
    %19 = vector.multi_reduction <add>, %14, %cst_19 [1] : vector<16x32xf32> to vector<16xf32>
    %20 = vector.shape_cast %19 : vector<16xf32> to vector<16x1xf32>
    %cst_20 = arith.constant 3.200000e+01 : f32
    %21 = vector.broadcast %cst_20 : f32 to vector<16x1xf32>
    %22 = arith.divf %20, %21 : vector<16x1xf32>
    %23 = vector.broadcast %22 : vector<16x1xf32> to vector<16x32xf32>
    %24 = arith.subf %14, %23 : vector<16x32xf32>
    %25 = arith.mulf %24, %24 : vector<16x32xf32>
    %cst_21 = arith.constant dense<0.000000e+00> : vector<16xf32>
    %26 = vector.multi_reduction <add>, %25, %cst_21 [1] : vector<16x32xf32> to vector<16xf32>
    %27 = vector.shape_cast %26 : vector<16xf32> to vector<16x1xf32>
    %cst_22 = arith.constant 3.200000e+01 : f32
    %28 = vector.broadcast %cst_22 : f32 to vector<16x1xf32>
    %29 = arith.divf %27, %28 : vector<16x1xf32>
    %cst_23 = arith.constant 9.99999996E-13 : f32
    %30 = vector.broadcast %cst_23 : f32 to vector<16x1xf32>
    %31 = arith.addf %29, %30 : vector<16x1xf32>
    %32 = math.rsqrt %31 : vector<16x1xf32>
    %33 = vector.broadcast %32 : vector<16x1xf32> to vector<16x32xf32>
    %34 = arith.mulf %24, %33 : vector<16x32xf32>
    %35 = vector.broadcast %17 : vector<1x32xf32> to vector<16x32xf32>
    %36 = arith.mulf %35, %34 : vector<16x32xf32>
    %37 = vector.broadcast %18 : vector<1x32xf32> to vector<16x32xf32>
    %38 = arith.addf %36, %37 : vector<16x32xf32>
    %c0_24 = arith.constant 0 : index
    %c0_25 = arith.constant 0 : index
    %39 = vector.load %arg12[%c0_24, %c0_25] : memref<16x32xf32, #tpu.memory_space<vmem>>, vector<16x32xf32>
    tpu.vector_store %arg12[%c0_24, %c0_25], %38 {strides = array<i32>} : memref<16x32xf32, #tpu.memory_space<vmem>>, vector<16x32xf32>,
    %c0_26 = arith.constant 0 : index
    %c0_27 = arith.constant 0 : index
    %40 = vector.load %arg10[%c0_26, %c0_27] : memref<1x32xf32, #tpu.memory_space<vmem>>, vector<1x32xf32>
    %c0_28 = arith.constant 0 : index
    %c0_29 = arith.constant 0 : index
    %41 = vector.load %arg11[%c0_28, %c0_29] : memref<1x32xf32, #tpu.memory_space<vmem>>, vector<1x32xf32>
    %cst_30 = arith.constant dense<0.000000e+00> : vector<16xf32>
    %42 = vector.multi_reduction <add>, %16, %cst_30 [1] : vector<16x32xf32> to vector<16xf32>
    %43 = vector.shape_cast %42 : vector<16xf32> to vector<16x1xf32>
    %cst_31 = arith.constant 3.200000e+01 : f32
    %44 = vector.broadcast %cst_31 : f32 to vector<16x1xf32>
    %45 = arith.divf %43, %44 : vector<16x1xf32>
    %46 = vector.broadcast %45 : vector<16x1xf32> to vector<16x32xf32>
    %47 = arith.subf %16, %46 : vector<16x32xf32>
    %48 = arith.mulf %47, %47 : vector<16x32xf32>
    %cst_32 = arith.constant dense<0.000000e+00> : vector<16xf32>
    %49 = vector.multi_reduction <add>, %48, %cst_32 [1] : vector<16x32xf32> to vector<16xf32>
    %50 = vector.shape_cast %49 : vector<16xf32> to vector<16x1xf32>
    %cst_33 = arith.constant 3.200000e+01 : f32
    %51 = vector.broadcast %cst_33 : f32 to vector<16x1xf32>
    %52 = arith.divf %50, %51 : vector<16x1xf32>
    %cst_34 = arith.constant 9.99999996E-13 : f32
    %53 = vector.broadcast %cst_34 : f32 to vector<16x1xf32>
    %54 = arith.addf %52, %53 : vector<16x1xf32>
    %55 = math.rsqrt %54 : vector<16x1xf32>
    %56 = vector.broadcast %55 : vector<16x1xf32> to vector<16x32xf32>
    %57 = arith.mulf %47, %56 : vector<16x32xf32>
    %58 = vector.broadcast %40 : vector<1x32xf32> to vector<16x32xf32>
    %59 = arith.mulf %58, %57 : vector<16x32xf32>
    %60 = vector.broadcast %41 : vector<1x32xf32> to vector<16x32xf32>
    %61 = arith.addf %59, %60 : vector<16x32xf32>
    %c0_35 = arith.constant 0 : index
    %c0_36 = arith.constant 0 : index
    %62 = vector.load %arg13[%c0_35, %c0_36] : memref<16x32xf32, #tpu.memory_space<vmem>>, vector<16x32xf32>
    tpu.vector_store %arg13[%c0_35, %c0_36], %61 {strides = array<i32>} : memref<16x32xf32, #tpu.memory_space<vmem>>, vector<16x32xf32>,
    return
  }
  func.func @transform_0(%arg0: i32) -> (i32, i32) {
    %c0_i32 = arith.constant 0 : i32
    %c0_i32_0 = arith.constant 0 : i32
    return %arg0, %c0_i32 : i32, i32
  }
  func.func @transform_1(%arg0: i32) -> (i32, i32) {
    %c0_i32 = arith.constant 0 : i32
    %c0_i32_0 = arith.constant 0 : i32
    return %arg0, %c0_i32 : i32, i32
  }
  func.func @transform_2(%arg0: i32) -> (i32, i32) {
    %c0_i32 = arith.constant 0 : i32
    %c0_i32_0 = arith.constant 0 : i32
    return %arg0, %c0_i32 : i32, i32
  }
  func.func @transform_3(%arg0: i32) -> (i32, i32) {
    %c0_i32 = arith.constant 0 : i32
    %c0_i32_0 = arith.constant 0 : i32
    %c0_i32_1 = arith.constant 0 : i32
    return %c0_i32, %c0_i32_0 : i32, i32
  }
  func.func @transform_4(%arg0: i32) -> (i32, i32) {
    %c0_i32 = arith.constant 0 : i32
    %c0_i32_0 = arith.constant 0 : i32
    %c0_i32_1 = arith.constant 0 : i32
    return %c0_i32, %c0_i32_0 : i32, i32
  }
  func.func @transform_5(%arg0: i32) -> (i32, i32) {
    %c0_i32 = arith.constant 0 : i32
    %c0_i32_0 = arith.constant 0 : i32
    %c0_i32_1 = arith.constant 0 : i32
    return %c0_i32, %c0_i32_0 : i32, i32
  }
  func.func @transform_6(%arg0: i32) -> (i32, i32) {
    %c0_i32 = arith.constant 0 : i32
    %c0_i32_0 = arith.constant 0 : i32
    %c0_i32_1 = arith.constant 0 : i32
    return %c0_i32, %c0_i32_0 : i32, i32
  }
  func.func @transform_7(%arg0: i32) -> (i32, i32) {
    %c0_i32 = arith.constant 0 : i32
    %c0_i32_0 = arith.constant 0 : i32
    %c0_i32_1 = arith.constant 0 : i32
    return %c0_i32, %c0_i32_0 : i32, i32
  }
  func.func @transform_8(%arg0: i32) -> (i32, i32) {
    %c0_i32 = arith.constant 0 : i32
    %c0_i32_0 = arith.constant 0 : i32
    %c0_i32_1 = arith.constant 0 : i32
    return %c0_i32, %c0_i32_0 : i32, i32
  }
  func.func @transform_9(%arg0: i32) -> (i32, i32) {
    %c0_i32 = arith.constant 0 : i32
    %c0_i32_0 = arith.constant 0 : i32
    %c0_i32_1 = arith.constant 0 : i32
    return %c0_i32, %c0_i32_0 : i32, i32
  }
  func.func @transform_10(%arg0: i32) -> (i32, i32) {
    %c0_i32 = arith.constant 0 : i32
    %c0_i32_0 = arith.constant 0 : i32
    %c0_i32_1 = arith.constant 0 : i32
    return %c0_i32, %c0_i32_0 : i32, i32
  }
  func.func @transform_11(%arg0: i32) -> (i32, i32) {
    %c0_i32 = arith.constant 0 : i32
    %c0_i32_0 = arith.constant 0 : i32
    return %arg0, %c0_i32 : i32, i32
  }
  func.func @transform_12(%arg0: i32) -> (i32, i32) {
    %c0_i32 = arith.constant 0 : i32
    %c0_i32_0 = arith.constant 0 : i32
    return %arg0, %c0_i32 : i32, i32
  }
}

</mosaic_0001>

<bundles_post_ra>
// kernel: intermediate_i_s.1
= control target key start
LH: loop header
LB: loop body
LE: loop exit
PB: predicated region body
PF: predicated region fallthrough
CT: control target
= control target key end

     0   :  { %18 = vsyncpa [#allocation3], 0  ;;  %vm69_vm0 = vcmask 523264   ;;  %s779_s0 = inlined_call_operand.vmem [shape: f32[16,192], index: 0, kind: input, shape index: {}]   ;;  %s780_s1 = inlined_call_operand.vmem [shape: f32[16,32], index: 1, kind: input, shape index: {}]   ;;  %s781_s2 = inlined_call_operand.vmem [shape: f32[16,32], index: 2, kind: input, shape index: {}]   ;;  %s782_s3 = inlined_call_operand.vmem [shape: f32[64,192], index: 3, kind: input, shape index: {}]   ;;  %s783_s4 = inlined_call_operand.vmem [shape: f32[1,64], index: 4, kind: input, shape index: {}]   ;;  %s784_s5 = inlined_call_operand.vmem [shape: f32[32,64], index: 5, kind: input, shape index: {}]   ;;  %s785_s6 = inlined_call_operand.vmem [shape: f32[1,32], index: 6, kind: input, shape index: {}]   ;;  %s786_s7 = inlined_call_operand.vmem [shape: f32[1,32], index: 7, kind: input, shape index: {}]   ;;  %s787_s8 = inlined_call_operand.vmem [shape: f32[1,32], index: 8, kind: input, shape index: {}]   ;;  %s788_s9 = inlined_call_operand.vmem [shape: f32[1,32], index: 9, kind: input, shape index: {}]   ;;  %s789_s10 = inlined_call_operand.vmem [shape: f32[1,32], index: 10, kind: input, shape index: {}]   ;;  %s790_s11 = inlined_call_operand.hbm [shape: f32[16,32], index: 11, kind: output, shape index: {0}]   ;;  %s791_s12 = inlined_call_operand.hbm [shape: f32[16,32], index: 12, kind: output, shape index: {1}]  }
   0x1   :  { %v47_v0 = vld [vmem:[%s782_s3 + $0x8] sm:$0xff]  ;;  %v49_v1 = vld [vmem:[%s782_s3 + $0x18] sm:$0xff]  ;;  %v46_v2 = vld [vmem:[%s782_s3] sm:$0xff] }
   0x2   :  { %v454_v3 = vpack.c.bf16 %v49_v1, %v47_v0  ;;  %vm626_vm1 = vmpackc.low %vm69_vm0, %vm69_vm0  ;;  %v48_v5 = vld [vmem:[%s782_s3 + $0x10] sm:$0xff]  ;;  %v51_v6 = vld [vmem:[%s782_s3 + $0x28] sm:$0xff] }
   0x3   :  { %v457_v7 = vpack.c.bf16 %v48_v5, %v46_v2  ;;  %v53_v8 = vld [vmem:[%s782_s3 + $0x38] sm:$0xff]  ;;  %v50_v10 = vld [vmem:[%s782_s3 + $0x20] sm:$0xff]  ;;  %v52_v11 = vld [vmem:[%s782_s3 + $0x30] sm:$0xff] }
   0x4   :  { %456 = vmatprep.subr.msk.bf16.mxu0 %vm626_vm1, %v454_v3  ;;  %v459_v9 = vpack.c.bf16 %v53_v8, %v51_v6  ;;  %v43_v12 = vld [vmem:[%s779_s0 + $0x8] sm:$0xff]  ;;  %v57_v14 = vld [vmem:[%s782_s3 + $0x58] sm:$0xff]  ;;  %v177_v15 = vld [vmem:[%s784_s5] sm:$0xff]  ;;  %v462_v17 = vpack.c.bf16 %v52_v11, %v50_v10 }
   0x5   :  { %458 = vmatpush1.bf16.xpose.msra.mxu0 %v457_v7  ;;  %v55_v13 = vld [vmem:[%s782_s3 + $0x48] sm:$0xff]  ;;  %424 = vmatprep.mubr.msk.f32.mxu0 %vm69_vm0, %v43_v12 }
   0x6   :  { %461 = vmatprep.subr.msk.bf16.mxu0 %vm626_vm1, %v459_v9  ;;  %v178_v16 = vld [vmem:[%s784_s5 + $0x8] sm:$0xff] }
   0x7   :  { %v474_v18 = vpack.c.bf16 %v178_v16, %v177_v15 }
   0x8   :  { %19 = vsyncpa [#allocation5], 0  ;;  %v464_v19 = vpack.c.bf16 %v57_v14, %v55_v13  ;;  %v54_v20 = vld [vmem:[%s782_s3 + $0x40] sm:$0xff]  ;;  %v56_v21 = vld [vmem:[%s782_s3 + $0x50] sm:$0xff]  ;;  %vm291_vm2 = vcmask 261120   ;;  %s546_s26 = smov [#allocation2]  }
   0x9   :  { %476 = vmatprep.subr.msk.bf16.mxu1 %vm626_vm1, %v474_v18  ;;  %v59_v22 = vld [vmem:[%s782_s3 + $0x68] sm:$0xff]  ;;  %v61_v23 = vld [vmem:[%s782_s3 + $0x78] sm:$0xff]  ;;  %v467_v24 = vpack.c.bf16 %v56_v21, %v54_v20  ;;  %v58_v26 = vld [vmem:[%s782_s3 + $0x60] sm:$0xff]  ;;  %s388_s27 = sshll.u32 %s546_s26, 4  ;;  %s389_s27 = int_to_ptr.vmem [resolvable:$true] %s388_s27 }
   0xa   :  { %479 = vmatpush3.bf16.xpose.msk.msra.mxu1 %vm626_vm1, %v474_v18  ;;  %v469_v25 = vpack.c.bf16 %v61_v23, %v59_v22  ;;  %v60_v27 = vld [vmem:[%s782_s3 + $0x70] sm:$0xff]  ;;  %v42_v29 = vld [vmem:[%s779_s0] sm:$0xff]  ;;  %v45_v30 = vld [vmem:[%s779_s0 + $0x18] sm:$0xff]  ;;  %p503_p1 = scmp.lt.s32.totalorder %s389_s27, %s389_s27 }
   0xb   :  { %v472_v28 = vpack.c.bf16 %v60_v27, %v58_v26  ;;  %v44_v31 = vld [vmem:[%s779_s0 + $0x10] sm:$0xff]  ;;  %v180_v33 = vld [vmem:[%s784_s5 + $0x18] sm:$0xff]  ;;  %v415_v35 = vld [vmem:[%s783_s4] ss:$0 sm:$0xff] }
   0xc   :  { %v179_v32 = vld [vmem:[%s784_s5 + $0x10] sm:$0xff]  ;;  %v426_v44 = vld [vmem:[%s785_s6] ss:$0 sm:$0xff]  ;;  %v286_v51 = vld [vmem:[%s781_s2 + $0x8] sm:$0xff] }
   0xd   :  { %463 = vmatpush1.bf16.xpose.msra.mxu0 %v462_v17  ;;  %v480_v34 = vpack.c.bf16 %v180_v33, %v179_v32  ;;  %v285_v47 = vld [vmem:[%s781_s2] sm:$0xff]  ;;  %v282_v52 = vld [vmem:[%s780_s1 + $0x8] sm:$0xff] }
   0xe   :  { %466 = vmatprep.subr.msk.bf16.mxu0 %vm626_vm1, %v464_v19  ;;  %v281_v48 = vld [vmem:[%s780_s1] sm:$0xff] }
   0xf   :  { %482 = vmatprep.subr.msk.bf16.mxu1 %vm626_vm1, %v480_v34  ;;  %v434_v32 = vld [vmem:[%s787_s8] ss:$0 sm:$0xff]  ;;  %s547_s8 = smov [#allocation4]  }
  0x10   :  { %s400_s29 = sshll.u32 %s547_s8, 4  ;;  %s401_s29 = int_to_ptr.vmem [resolvable:$true] %s400_s29 }
  0x12   :  { %485 = vmatpush3.bf16.xpose.msk.msra.mxu1 %vm626_vm1, %v480_v34 }
  0x15   :  { %468 = vmatpush1.bf16.xpose.msra.mxu0 %v467_v24 }
  0x16   :  { %471 = vmatprep.subr.msk.bf16.mxu0 %vm626_vm1, %v469_v25 }
  0x1d   :  { %473 = vmatpush1.bf16.xpose.msra.mxu0 %v472_v28 }
  0x24   :  { %165 = vmatmul.mubr.f32.vlgmr.msra.gmra.mrb[0].mxu0 %v42_v29 }
  0x25   :  { %425 = vmatprep.mubr.msk.f32.mxu0 %vm69_vm0, %v45_v30  ;;  %v433_v30 = vld [vmem:[%s786_s7] ss:$0 sm:$0xff] }
  0x28   :  { %170 = vmatmul.mubr.f32.gmra.mrb[2].mxu0 %v44_v31 }
  0xf7   :  { %v166_v36 = vpop.f32.mrb[0].mxu0 }
  0xf8   :  { %v167_v37 = vadd.f32 %v415_v35, %v166_v36  ;;  %v168_v38 = vpop.f32.mrb[1].mxu0 }
  0xf9   :  { %v435_v38 = vld [vmem:[%s788_s9] ss:$0 sm:$0xff]  ;;  %s498_s9 = scalar_lea.vmem %s389_s27, 256 }
  0xfa   :  { %v175_v39 = vmax.f32 %v167_v37, 0.0  ;;  %p499_p0 = scmp.ne.s32.totalorder %s389_s27, %s498_s9  ;;  %p504_p2 = scmp.lt.s32.totalorder %s498_s9, %s498_s9 }
  0xfb   :  { %v171_v40 = vpop.f32.mrb[2].mxu0 }
  0xfc   :  { %v172_v41 = vadd.f32 %v415_v35, %v171_v40  ;;  %v173_v42 = vpop.f32.mrb[3].mxu0  ;;  %451 = vmatprep.mubr.msk.f32.mxu1 %vm69_vm0, %v175_v39  ;;  %p505_p3 = por %p504_p2, %p503_p1 }
  0xfe   :  { %v176_v43 = vmax.f32 %v172_v41, 0.0  ;;  %v436_v41 = vld [vmem:[%s789_s10] ss:$0 sm:$0xff]  ;;  %p506_p4 = pnand %p505_p3, %p499_p0 }
 0x100   :  { %452 = vmatmul.mubr.msk.f32.vlgmr.msra.gmra.mrb[0].mxu1 %vm69_vm0, %v176_v43 }
 0x1d3   :  { %v453_v45 = vpop.f32.mrb[0].mxu1 }
 0x1d4   :  { %v272_v46 = vpop.f32.mrb[1].mxu1  ;;  %v278_v49 = vadd.f32 %v453_v45, %v426_v44 }
 0x1d5   :  { %v273_v50 = vadd.f32 %v426_v44, %v272_v46 }
 0x1d6   :  { %v288_v57 = vadd.f32 %v286_v51, %v278_v49  ;;  %v284_v58 = vadd.f32 %v282_v52, %v278_v49 }
 0x1d7   :  { %v287_v53 = vadd.f32 %v285_v47, %v273_v50  ;;  %v283_v54 = vadd.f32 %v281_v48, %v273_v50 }
 0x1d8   :  { %v342_v59 = vsel %vm291_vm2, %v288_v57, 0.0  ;;  %v295_v60 = vsel %vm291_vm2, %v284_v58, 0.0 }
 0x1d9   :  { %v339_v55 = vsel %vm291_vm2, %v287_v53, 0.0  ;;  %v292_v56 = vsel %vm291_vm2, %v283_v54, 0.0 }
 0x1da   :  { %340 = vadd.xlane.f32.xlu1 %v339_v55  ;;  %293 = vadd.xlane.f32.xlu0 %v292_v56 }
 0x1de   :  { %343 = vadd.xlane.f32.xlu1 %v342_v59  ;;  %296 = vadd.xlane.f32.xlu0 %v295_v60 }
 0x267   :  { %v341_v61 = vpop.xlane.xlu1 %340  ;;  %v294_v62 = vpop.xlane.xlu0 %293 }
 0x268   :  { %v345_v63 = vmul.f32 0.03125, %v341_v61  ;;  %v299_v0 = vmul.f32 0.03125, %v294_v62 }
 0x26a   :  { %v347_v1 = vsub.f32 %v287_v53, %v345_v63  ;;  %v301_v2 = vsub.f32 %v283_v54, %v299_v0 }
 0x26b   :  { %v344_v3 = vpop.xlane.xlu1 %343  ;;  %v297_v4 = vpop.xlane.xlu0 %296 }
 0x26c   :  { %v346_v5 = vmul.f32 0.03125, %v344_v3  ;;  %v300_v6 = vmul.f32 0.03125, %v297_v4  ;;  %v303_v7 = vmul.f32 %v301_v2, %v301_v2  ;;  %v349_v11 = vmul.f32 %v347_v1, %v347_v1 }
 0x26e   :  { %v348_v8 = vsub.f32 %v288_v57, %v346_v5  ;;  %v302_v9 = vsub.f32 %v284_v58, %v300_v6  ;;  %v305_v10 = vsel %vm291_vm2, %v303_v7, 0.0  ;;  %v351_v13 = vsel %vm291_vm2, %v349_v11, 0.0 }
 0x26f   :  { %306 = vadd.xlane.f32.xlu0 %v305_v10 }
 0x270   :  { %v304_v12 = vmul.f32 %v302_v9, %v302_v9  ;;  %v350_v15 = vmul.f32 %v348_v8, %v348_v8 }
 0x272   :  { %v308_v14 = vsel %vm291_vm2, %v304_v12, 0.0  ;;  %v354_v16 = vsel %vm291_vm2, %v350_v15, 0.0 }
 0x273   :  { %352 = vadd.xlane.f32.xlu0 %v351_v13  ;;  %309 = vadd.xlane.f32.xlu1 %v308_v14 }
 0x277   :  { %355 = vadd.xlane.f32.xlu1 %v354_v16 }
 0x2fc   :  { %v307_v17 = vpop.xlane.xlu0 %306 }
 0x2fd   :  { %v311_v18 = vmul.f32 0.03125, %v307_v17 }
 0x2ff   :  { %v313_v19 = vadd.f32 1e-12, %v311_v18 }
 0x300   :  { %v310_v20 = vpop.xlane.xlu1 %309  ;;  %v353_v21 = vpop.xlane.xlu0 %352 }
 0x301   :  { %490 = vrsqrt.f32 %v313_v19  ;;  %v312_v22 = vmul.f32 0.03125, %v310_v20  ;;  %v357_v23 = vmul.f32 0.03125, %v353_v21 }
 0x303   :  { %v314_v24 = vadd.f32 1e-12, %v312_v22  ;;  %v359_v25 = vadd.f32 1e-12, %v357_v23 }
 0x304   :  { %v356_v26 = vpop.xlane.xlu1 %355 }
 0x305   :  { %492 = vrsqrt.f32 %v314_v24  ;;  %v358_v27 = vmul.f32 0.03125, %v356_v26 }
 0x306   :  { %494 = vrsqrt.f32 %v359_v25 }
 0x307   :  { %v360_v28 = vadd.f32 1e-12, %v358_v27 }
 0x309   :  { %496 = vrsqrt.f32 %v360_v28 }
 0x30b   :  { %v491_v29 = vpop.eup %490 }
 0x30c   :  { %v317_v31 = vmul.f32 %v491_v29, %v301_v2 }
 0x30e   :  { %v325_v33 = vmul.f32 %v433_v30, %v317_v31 }
 0x30f   :  { %v493_v34 = vpop.eup %492 }
 0x310   :  { %v495_v35 = vpop.eup %494  ;;  %v318_v36 = vmul.f32 %v493_v34, %v302_v9  ;;  %v333_v37 = vadd.f32 %v434_v32, %v325_v33 }
 0x311   :  { %v363_v39 = vmul.f32 %v495_v35, %v347_v1 }
 0x312   :  { %v326_v40 = vmul.f32 %v433_v30, %v318_v36  ;;  %335 = vst.msk [vmem:[#allocation2] sm:$0xff] %vm291_vm2, %v333_v37 }
 0x313   :  { %v497_v42 = vpop.eup %496  ;;  %v371_v43 = vmul.f32 %v435_v38, %v363_v39 }
 0x314   :  { %v364_v44 = vmul.f32 %v497_v42, %v348_v8  ;;  %v334_v45 = vadd.f32 %v434_v32, %v326_v40 }
 0x315   :  { %v379_v46 = vadd.f32 %v436_v41, %v371_v43 }
 0x316   :  { %336 = vst.msk [vmem:[#allocation2 + $0x8] sm:$0xff] %vm291_vm2, %v334_v45  ;;  %v372_v47 = vmul.f32 %v435_v38, %v364_v44 }
 0x317   :  { %509 = shalt.err (!%p506_p4)
}
 0x318   :  { %s510_s30 = scalar_lea.hbm %s790_s11, 256 }
 0x319   :  { %p511_p5 = scmp.ne.s32.totalorder %s790_s11, %s510_s30  ;;  %p514_p6 = scmp.lt.u32.totalorder %s510_s30, %s790_s11 }
 0x31b   :  { %p516_p7 = pnand %p514_p6, %p511_p5 }
 0x31d   :  { %519 = shalt.err (!%p516_p7)
}
 0x31e   :  { %s548_s5 = smov 128   ;;  %s549_s16 = smov 8   ;;  %381 = vst.msk [vmem:[#allocation4] sm:$0xff] %vm291_vm2, %v379_v46  ;;  %v380_v48 = vadd.f32 %v436_v41, %v372_v47 }
 0x31f   :  { %394 = dma.vmem_to_hbm [thread:$0]  %s389_s27, 256, %s790_s11, [#allocation3], %s548_s5, %s548_s5, %s549_s16  }
 0x320   :  { %382 = vst.msk [vmem:[#allocation4 + $0x8] sm:$0xff] %vm291_vm2, %v380_v48  ;;  %s520_s18 = scalar_lea.vmem %s401_s29, 256  ;;  %p525_p9 = scmp.lt.s32.totalorder %s401_s29, %s401_s29 }
 0x321   :  { %p521_p8 = scmp.ne.s32.totalorder %s401_s29, %s520_s18  ;;  %p526_p10 = scmp.lt.s32.totalorder %s520_s18, %s520_s18 }
 0x323   :  { %p527_p11 = por %p526_p10, %p525_p9 }
 0x325   :  { %p528_p12 = pnand %p527_p11, %p521_p8 }
 0x327   :  { %531 = shalt.err (!%p528_p12)
}
 0x328   :  { %s532_s21 = scalar_lea.hbm %s791_s12, 256 }
 0x329   :  { %p533_p13 = scmp.ne.s32.totalorder %s791_s12, %s532_s21  ;;  %p536_p0 = scmp.lt.u32.totalorder %s532_s21, %s791_s12 }
 0x32b   :  { %p538_p1 = pnand %p536_p0, %p533_p13 }
 0x32d   :  { %541 = shalt.err (!%p538_p1)
}
 0x32e   :  { %406 = dma.vmem_to_hbm [thread:$0]  %s401_s29, 256, %s791_s12, [#allocation5], %s548_s5, %s548_s5, %s549_s16  }
 0x32f   :  { %542 = dma.done.wait [#allocation3], 256  }
 0x330   :  { %543 = vsyncadd [#allocation3], 4294967040 }
 0x331   :  { %544 = dma.done.wait [#allocation5], 256  }
 0x332   :  { %545 = vsyncadd [#allocation5], 4294967040 }
 0x333   :  { %413 = vsyncpa [#allocation3], 1 }
 0x334   :  { %414 = vsyncpa [#allocation5], 1 }

</bundles_post_ra>
